<compile_context>
chip_gen: v7x
topology: tpu7x:2x2x1
jax: 0.10.0
libtpu: 0.0.40
codegen_flags: <defaults>
</compile_context>

<pallas_src>
import jax
import jax.numpy as jnp
from jax.experimental import pallas as pl
from jax.experimental.pallas import tpu as pltpu

EPS = 1e-5


def _round_up(x, m):
    return ((x + m - 1) // m) * m


def ff_block_kernel(x_ref, w_ref, b_ref, scale_ref, shift_ref, o_ref):
    # Linear: (tm, K) bf16 @ (K, tn) bf16 -> (tm, tn) f32 accumulate on the MXU.
    h = jnp.dot(x_ref[...], w_ref[...], preferred_element_type=jnp.float32)
    # Bias + ReLU.
    h = jnp.maximum(h + b_ref[...], 0.0)
    # Folded BatchNorm (eval mode): one mul + one add per element.
    o_ref[...] = (h * scale_ref[...] + shift_ref[...]).astype(o_ref.dtype)


def feed_forward_block(x, weight, bias, gamma, beta, running_mean, running_var,
                       *, tm=256, tn=512):
    """x: (N, input_dim) float32; weight: (output_dim, input_dim) (PyTorch layout)."""
    N, input_dim = x.shape
    output_dim = weight.shape[0]

    # ---- Fold BatchNorm1d (running stats, affine) into scale/shift ----------
    scale = gamma * jax.lax.rsqrt(running_var + EPS)
    shift = beta - running_mean * scale

    # ---- Tile sizing / padding ----------------------------------------------
    # Output tile: lane-dense multiple of 128; pad output_dim up to a multiple.
    tn_eff = min(tn, _round_up(output_dim, 128))
    d_pad = _round_up(output_dim, tn_eff)
    # Batch tile: multiple of 16 (bf16 sublane packing); clamp for small N and
    # zero-pad the batch to a whole number of tiles (ragged tail handling).
    tm_eff = min(tm, _round_up(N, 16))
    n_pad = _round_up(N, tm_eff)

    # ---- Wrapper glue: pad, transpose, cast ---------------------------------
    x_p = jnp.zeros((n_pad, input_dim), dtype=jnp.bfloat16)
    x_p = x_p.at[:N, :].set(x.astype(jnp.bfloat16))

    w_p = jnp.zeros((input_dim, d_pad), dtype=jnp.bfloat16)
    w_p = w_p.at[:, :output_dim].set(weight.T.astype(jnp.bfloat16))

    def pad_row(v):
        r = jnp.zeros((1, d_pad), dtype=jnp.float32)
        return r.at[0, :output_dim].set(v.astype(jnp.float32))

    b_row = pad_row(bias)
    scale_row = pad_row(scale)
    shift_row = pad_row(shift)

    grid = (n_pad // tm_eff, d_pad // tn_eff)
    row_spec = pl.BlockSpec((1, tn_eff), lambda i, j: (0, j))

    out_padded = pl.pallas_call(
        ff_block_kernel,
        out_shape=jax.ShapeDtypeStruct((n_pad, d_pad), jnp.float32),
        grid_spec=pltpu.PrefetchScalarGridSpec(
            num_scalar_prefetch=0,
            grid=grid,
            in_specs=[
                pl.BlockSpec((tm_eff, input_dim), lambda i, j: (i, 0)),   # x tile
                pl.BlockSpec((input_dim, tn_eff), lambda i, j: (0, j)),   # W^T tile
                row_spec,   # bias
                row_spec,   # folded BN scale
                row_spec,   # folded BN shift
            ],
            out_specs=pl.BlockSpec((tm_eff, tn_eff), lambda i, j: (i, j)),
        ),
        compiler_params=pltpu.CompilerParams(
            dimension_semantics=("parallel", "parallel")),
    )(x_p, w_p, b_row, scale_row, shift_row)

    return out_padded[:N, :output_dim]


if __name__ == "__main__":
    key = jax.random.PRNGKey(0)
    k_x, k_w, k_b = jax.random.split(key, 3)

    batch = 16
    input_dim = 32
    output_dim = 64

    x = jax.random.normal(k_x, (batch, input_dim), dtype=jnp.float32)

    # Deterministic parameter init (PyTorch nn.Linear-style uniform bounds).
    bound = 1.0 / (input_dim ** 0.5)
    weight = jax.random.uniform(k_w, (output_dim, input_dim),
                                minval=-bound, maxval=bound, dtype=jnp.float32)
    bias = jax.random.uniform(k_b, (output_dim,),
                              minval=-bound, maxval=bound, dtype=jnp.float32)

    # BatchNorm1d defaults: gamma=1, beta=0, running_mean=0, running_var=1.
    gamma = jnp.ones((output_dim,), dtype=jnp.float32)
    beta = jnp.zeros((output_dim,), dtype=jnp.float32)
    running_mean = jnp.zeros((output_dim,), dtype=jnp.float32)
    running_var = jnp.ones((output_dim,), dtype=jnp.float32)

    out = feed_forward_block(x, weight, bias, gamma, beta,
                             running_mean, running_var)
    out = jax.block_until_ready(out)

    # Pure-JAX f32 reference (eval-mode semantics). Looser tolerance because the
    # kernel uses bf16 inputs with f32 accumulation.
    h_ref = jnp.maximum(x @ weight.T + bias, 0.0)
    ref = (h_ref - running_mean) * jax.lax.rsqrt(running_var + EPS) * gamma + beta
    assert out.shape == (batch, output_dim)
    assert jnp.allclose(out, ref, atol=2e-2, rtol=2e-2)

    print("KERNEL_OK")
</pallas_src>

<mosaic_0001>
module attributes {stable_mosaic.version = 11 : i64} {
  func.func @ff_block_kernel(%arg0: i32, %arg1: i32, %arg2: memref<16x32xbf16, #tpu.memory_space<vmem>>, %arg3: memref<32x128xbf16, #tpu.memory_space<vmem>>, %arg4: memref<1x128xf32, #tpu.memory_space<vmem>>, %arg5: memref<1x128xf32, #tpu.memory_space<vmem>>, %arg6: memref<1x128xf32, #tpu.memory_space<vmem>>, %arg7: memref<16x128xf32, #tpu.memory_space<vmem>>) attributes {dimension_semantics = [#tpu.dimension_semantics<parallel>, #tpu.dimension_semantics<parallel>], iteration_bounds = array<i64: 1, 1>, scalar_prefetch = 0 : i64, scratch_operands = 0 : i64, tpu.core_type = #tpu.core_type<tc>, window_params = [{transform_indices = @transform_0, window_bounds = array<i64: 16, 32>}, {transform_indices = @transform_1, window_bounds = array<i64: 32, 128>}, {transform_indices = @transform_2, window_bounds = array<i64: 1, 128>}, {transform_indices = @transform_3, window_bounds = array<i64: 1, 128>}, {transform_indices = @transform_4, window_bounds = array<i64: 1, 128>}, {transform_indices = @transform_5, window_bounds = array<i64: 16, 128>}]} {
    %c0 = arith.constant 0 : index
    %c0_0 = arith.constant 0 : index
    %0 = vector.load %arg2[%c0, %c0_0] : memref<16x32xbf16, #tpu.memory_space<vmem>>, vector<16x32xbf16>
    %c0_1 = arith.constant 0 : index
    %c0_2 = arith.constant 0 : index
    %1 = vector.load %arg3[%c0_1, %c0_2] : memref<32x128xbf16, #tpu.memory_space<vmem>>, vector<32x128xbf16>
    %cst = arith.constant dense<0.000000e+00> : vector<16x128xf32>
    %2 = tpu.matmul %0, %1, %cst {dimension_numbers = #tpu.dot_dimension_numbers<[1], [0], [0], [1], [0, 0, 1, 1], [], []>} : vector<16x32xbf16>, vector<32x128xbf16>, vector<16x128xf32> -> vector<16x128xf32>
    %c0_3 = arith.constant 0 : index
    %c0_4 = arith.constant 0 : index
    %3 = vector.load %arg4[%c0_3, %c0_4] : memref<1x128xf32, #tpu.memory_space<vmem>>, vector<1x128xf32>
    %4 = vector.broadcast %3 : vector<1x128xf32> to vector<16x128xf32>
    %5 = arith.addf %2, %4 : vector<16x128xf32>
    %cst_5 = arith.constant 0.000000e+00 : f32
    %6 = vector.broadcast %cst_5 : f32 to vector<16x128xf32>
    %7 = arith.maximumf %5, %6 : vector<16x128xf32>
    %c0_6 = arith.constant 0 : index
    %c0_7 = arith.constant 0 : index
    %8 = vector.load %arg5[%c0_6, %c0_7] : memref<1x128xf32, #tpu.memory_space<vmem>>, vector<1x128xf32>
    %9 = vector.broadcast %8 : vector<1x128xf32> to vector<16x128xf32>
    %10 = arith.mulf %7, %9 : vector<16x128xf32>
    %c0_8 = arith.constant 0 : index
    %c0_9 = arith.constant 0 : index
    %11 = vector.load %arg6[%c0_8, %c0_9] : memref<1x128xf32, #tpu.memory_space<vmem>>, vector<1x128xf32>
    %12 = vector.broadcast %11 : vector<1x128xf32> to vector<16x128xf32>
    %13 = arith.addf %10, %12 : vector<16x128xf32>
    %c0_10 = arith.constant 0 : index
    %c0_11 = arith.constant 0 : index
    %14 = vector.load %arg7[%c0_10, %c0_11] : memref<16x128xf32, #tpu.memory_space<vmem>>, vector<16x128xf32>
    tpu.vector_store %arg7[%c0_10, %c0_11], %13 {strides = array<i32>} : memref<16x128xf32, #tpu.memory_space<vmem>>, vector<16x128xf32>,
    return
  }
  func.func @transform_0(%arg0: i32, %arg1: i32) -> (i32, i32) {
    %c0_i32 = arith.constant 0 : i32
    %c0_i32_0 = arith.constant 0 : i32
    return %arg0, %c0_i32 : i32, i32
  }
  func.func @transform_1(%arg0: i32, %arg1: i32) -> (i32, i32) {
    %c0_i32 = arith.constant 0 : i32
    %c0_i32_0 = arith.constant 0 : i32
    return %c0_i32, %arg1 : i32, i32
  }
  func.func @transform_2(%arg0: i32, %arg1: i32) -> (i32, i32) {
    %c0_i32 = arith.constant 0 : i32
    %c0_i32_0 = arith.constant 0 : i32
    return %c0_i32, %arg1 : i32, i32
  }
  func.func @transform_3(%arg0: i32, %arg1: i32) -> (i32, i32) {
    %c0_i32 = arith.constant 0 : i32
    %c0_i32_0 = arith.constant 0 : i32
    return %c0_i32, %arg1 : i32, i32
  }
  func.func @transform_4(%arg0: i32, %arg1: i32) -> (i32, i32) {
    %c0_i32 = arith.constant 0 : i32
    %c0_i32_0 = arith.constant 0 : i32
    return %c0_i32, %arg1 : i32, i32
  }
  func.func @transform_5(%arg0: i32, %arg1: i32) -> (i32, i32) {
    %c0_i32 = arith.constant 0 : i32
    return %arg0, %arg1 : i32, i32
  }
}

</mosaic_0001>

<bundles_post_ra>
// kernel: tpu_custom_call.1
= control target key start
LH: loop header
LB: loop body
LE: loop exit
PB: predicated region body
PF: predicated region fallthrough
CT: control target
= control target key end

     0   :  { %10 = vsyncpa [#allocation3], 0  ;;  %s351_s0 = inlined_call_operand.hbm [shape: bf16[16,32], index: 0, kind: input, shape index: {}]   ;;  %s352_s1 = inlined_call_operand.hbm [shape: bf16[32,128], index: 1, kind: input, shape index: {}]   ;;  %s353_s2 = inlined_call_operand.vmem [shape: f32[1,128], index: 2, kind: input, shape index: {}]   ;;  %s354_s3 = inlined_call_operand.vmem [shape: f32[1,128], index: 3, kind: input, shape index: {}]   ;;  %s355_s4 = inlined_call_operand.vmem [shape: f32[1,128], index: 4, kind: input, shape index: {}]   ;;  %s356_s5 = inlined_call_operand.hbm [shape: f32[16,128], index: 5, kind: output, shape index: {}]  }
   0x1   :  { %11 = vsyncpa [#allocation6], 0 }
   0x2   :  { %12 = vsyncpa [#allocation4], 0  ;;  %s267_s18 = smov [#allocation2]   ;;  %s195_s22 = scalar_lea.hbm %s351_s0, 128 }
   0x3   :  { %s18_s19 = sshll.u32 %s267_s18, 4  ;;  %p196_p0 = scmp.ne.s32.totalorder %s351_s0, %s195_s22  ;;  %s19_s19 = int_to_ptr.vmem [resolvable:$true] %s18_s19 }
   0x4   :  { %p199_p1 = scmp.lt.u32.totalorder %s195_s22, %s351_s0 }
   0x6   :  { %p201_p2 = pnand %p199_p1, %p196_p0 }
   0x8   :  { %204 = shalt.err (!%p201_p2)
}
   0x9   :  { %s205_s27 = scalar_lea.vmem %s19_s19, 128  ;;  %p210_p4 = scmp.lt.s32.totalorder %s19_s19, %s19_s19 }
   0xa   :  { %p206_p3 = scmp.ne.s32.totalorder %s19_s19, %s205_s27  ;;  %p211_p5 = scmp.lt.s32.totalorder %s205_s27, %s205_s27 }
   0xc   :  { %p212_p6 = por %p211_p5, %p210_p4 }
   0xe   :  { %p213_p7 = pnand %p212_p6, %p206_p3 }
  0x10   :  { %216 = shalt.err (!%p213_p7)
}
  0x11   :  { %s268_s28 = smov 64   ;;  %s269_s29 = smov 4  }
  0x12   :  { %24 = dma.hbm_to_vmem [thread:$0]  %s351_s0, 128, %s19_s19, [#allocation3], %s268_s28, %s268_s28, %s269_s29  }
  0x13   :  { %s270_s7 = smov [#allocation5]   ;;  %s217_s11 = scalar_lea.hbm %s352_s1, 256 }
  0x14   :  { %s30_s8 = sshll.u32 %s270_s7, 4  ;;  %p218_p8 = scmp.ne.s32.totalorder %s352_s1, %s217_s11  ;;  %s31_s8 = int_to_ptr.vmem [resolvable:$true] %s30_s8 }
  0x15   :  { %p221_p9 = scmp.lt.u32.totalorder %s217_s11, %s352_s1 }
  0x17   :  { %p223_p10 = pnand %p221_p9, %p218_p8 }
  0x19   :  { %226 = shalt.err (!%p223_p10)
}
  0x1a   :  { %s227_s16 = scalar_lea.vmem %s31_s8, 256  ;;  %p232_p12 = scmp.lt.s32.totalorder %s31_s8, %s31_s8 }
  0x1b   :  { %p228_p11 = scmp.ne.s32.totalorder %s31_s8, %s227_s16  ;;  %p233_p13 = scmp.lt.s32.totalorder %s227_s16, %s227_s16 }
  0x1d   :  { %p234_p0 = por %p233_p13, %p232_p12 }
  0x1f   :  { %p235_p1 = pnand %p234_p0, %p228_p11 }
  0x21   :  { %238 = shalt.err (!%p235_p1)
}
  0x22   :  { %36 = dma.hbm_to_vmem [thread:$0]  %s352_s1, 256, %s31_s8, [#allocation6], %s268_s28, %s268_s28, %s269_s29  }
  0x23   :  { %261 = dma.done.wait [#allocation3], 128  }
  0x24   :  { %262 = vsyncadd [#allocation3], 4294967168 }
  0x25   :  { %263 = dma.done.wait [#allocation6], 256  }
  0x26   :  { %264 = vsyncadd [#allocation6], 4294967040  ;;  %v271_v0 = vmov 0.0   ;;  %vm272_vm0 = vmmov 0   ;;  %v192_v1 = vld [vmem:[#allocation5] sm:$0xff]   ;;  %v193_v2 = vld [vmem:[#allocation5 + $0x8] sm:$0xff]  }
  0x27   :  { %175 = vmatprep.subr.bf16.mxu0 %v271_v0  ;;  %179 = vmatprep.mubr.msk.bf16.mxu0 %vm272_vm0, %v271_v0  ;;  %v194_v3 = vld [vmem:[#allocation2] sm:$0xff]   ;;  %vm80_vm1 = vcmask 261120   ;;  %s273_s23 = smov [#allocation7]  }
  0x28   :  { %176 = vmatpush3.bf16.msra.mxu0 %v192_v1  ;;  %v165_v4 = vld [vmem:[%s353_s2] ss:$0 sm:$0xff]  ;;  %s152_s24 = sshll.u32 %s273_s23, 4  ;;  %s153_s24 = int_to_ptr.vmem [resolvable:$true] %s152_s24 }
  0x29   :  { %177 = vmatprep.subr.bf16.mxu0 %v271_v0  ;;  %v170_v8 = vld [vmem:[%s354_s3] ss:$0 sm:$0xff]  ;;  %s239_s2 = scalar_lea.vmem %s153_s24, 256  ;;  %p244_p3 = scmp.lt.s32.totalorder %s153_s24, %s153_s24 }
  0x2a   :  { %v171_v13 = vld [vmem:[%s355_s4] ss:$0 sm:$0xff]  ;;  %p240_p2 = scmp.ne.s32.totalorder %s153_s24, %s239_s2  ;;  %p245_p4 = scmp.lt.s32.totalorder %s239_s2, %s239_s2 }
  0x2c   :  { %178 = vmatpush3.bf16.msra.mxu0 %v193_v2  ;;  %p246_p5 = por %p245_p4, %p244_p3 }
  0x2e   :  { %p247_p6 = pnand %p246_p5, %p240_p2 }
  0x2f   :  { %180 = vmatmul.mubr.msk.bf16.vlgmr.msra.gmra.mrb[0].mxu0 %vm80_vm1, %v194_v3 }
 0x102   :  { %v118_v5 = vpop.f32.mrb[0].mxu0 }
 0x103   :  { %v119_v6 = vadd.f32 %v165_v4, %v118_v5  ;;  %v181_v7 = vpop.f32.mrb[1].mxu0 }
 0x104   :  { %v121_v9 = vpop.f32.mrb[2].mxu0 }
 0x105   :  { %v125_v10 = vmax.f32 %v119_v6, 0.0  ;;  %v122_v11 = vadd.f32 %v165_v4, %v121_v9  ;;  %v182_v12 = vpop.f32.mrb[3].mxu0 }
 0x107   :  { %v134_v14 = vmul.f32 %v170_v8, %v125_v10  ;;  %v126_v15 = vmax.f32 %v122_v11, 0.0 }
 0x109   :  { %v143_v16 = vadd.f32 %v171_v13, %v134_v14  ;;  %v135_v17 = vmul.f32 %v170_v8, %v126_v15 }
 0x10b   :  { %145 = vst [vmem:[#allocation7] sm:$0xff] %v143_v16  ;;  %v144_v18 = vadd.f32 %v171_v13, %v135_v17 }
 0x10d   :  { %146 = vst [vmem:[#allocation7 + $0x8] sm:$0xff] %v144_v18 }
 0x10e   :  { %250 = shalt.err (!%p247_p6)
}
 0x10f   :  { %s251_s4 = scalar_lea.hbm %s356_s5, 256 }
 0x110   :  { %p252_p7 = scmp.ne.s32.totalorder %s356_s5, %s251_s4  ;;  %p255_p8 = scmp.lt.u32.totalorder %s251_s4, %s356_s5 }
 0x112   :  { %p257_p9 = pnand %p255_p8, %p252_p7 }
 0x114   :  { %260 = shalt.err (!%p257_p9)
}
 0x115   :  { %s274_s30 = smov 128   ;;  %s275_s6 = smov 8  }
 0x116   :  { %158 = dma.vmem_to_hbm [thread:$0]  %s153_s24, 256, %s356_s5, [#allocation4], %s274_s30, %s274_s30, %s275_s6  }
 0x117   :  { %265 = dma.done.wait [#allocation4], 256  }
 0x118   :  { %266 = vsyncadd [#allocation4], 4294967040 }
 0x119   :  { %162 = vsyncpa [#allocation3], 1 }
 0x11a   :  { %163 = vsyncpa [#allocation6], 1 }
 0x11b   :  { %164 = vsyncpa [#allocation4], 1 }

</bundles_post_ra>
